<compile_context>
chip_gen: v7x
topology: tpu7x:2x2x1
jax: 0.10.0
libtpu: 0.0.40
codegen_flags: <defaults>
</compile_context>

<pallas_src>
import jax
import jax.numpy as jnp
from jax.experimental import pallas as pl
from jax.experimental.pallas import tpu as pltpu


def _seg_merging_kernel(x_ref, w_ref, gamma_ref, beta_ref, bias_ref, o_ref):
    """LayerNorm(D_in) + Linear(D_in -> D_out) on a (TN, D_in) row tile."""
    x = x_ref[...].astype(jnp.float32)                       # (TN, D_in)

    # Two-pass LayerNorm (torch parity): mean first, then centered variance.
    mean = jnp.mean(x, axis=-1, keepdims=True)                # XLU reduce
    xc = x - mean
    var = jnp.mean(xc * xc, axis=-1, keepdims=True)           # XLU reduce (non-negative)
    rstd = jax.lax.rsqrt(var + 1e-5)                          # EUP; eps = torch default
    xn = xc * rstd
    xn = xn * gamma_ref[...].astype(jnp.float32) + beta_ref[...].astype(jnp.float32)

    # Feed the MXU at the weight's native dtype (bf16 weight -> native rate),
    # accumulate in f32.
    y = jnp.dot(xn.astype(w_ref.dtype), w_ref[...],
                preferred_element_type=jnp.float32)
    y = y + bias_ref[...].astype(jnp.float32)
    o_ref[...] = y.astype(o_ref.dtype)


def _round_up(v, m):
    return ((v + m - 1) // m) * m


def seg_merging_pallas(x, w, bias, gamma, beta, win_size, *,
                       target_block_bytes=1 << 20, min_grid_steps=4):
    """x: (B, n_feat, seg_num, seg_dim). Returns (B, n_feat, ceil(seg_num/win), seg_dim).

    w      : (win*seg_dim, seg_dim)   -- transposed vs. torch Linear weight
    bias   : (seg_dim,)
    gamma  : (win*seg_dim,)           -- LayerNorm weight
    beta   : (win*seg_dim,)           -- LayerNorm bias
    """
    B, F, S, D = x.shape
    pad_num = S % win_size
    if pad_num != 0:
        pad_num = win_size - pad_num
        # TODO(synk): this concat rewrites the whole tensor in HBM (~2x extra traffic
        # whenever seg_num % win_size != 0).  Removing it needs either (a) fusing the
        # merge with the consumer, or (b) an element-granularity gather of the ragged
        # tail window inside the kernel (scalar-prefetched segment table); both force
        # the kernel to read x at (seg, seg_dim) granularity, which with seg_dim < 128
        # requires in-kernel relayouts not yet validated on hardware.
        x = jnp.concatenate([x, x[:, :, -pad_num:, :]], axis=2)
    M = x.shape[2] // win_size
    D_in = win_size * D
    D_out = w.shape[1]

    # For contiguous windows, cat([x[:,:,i::win,:] for i in range(win)], -1) == reshape
    # (free, no data movement).
    x_rows = x.reshape(B * F * M, D_in)
    N = x_rows.shape[0]

    gamma2 = gamma.reshape(1, D_in)
    beta2 = beta.reshape(1, D_in)
    bias2 = bias.reshape(1, D_out)

    # ---- Row-tile selection: size by bytes, guarantee pipeline / megacore depth ----
    row_bytes = D_in * x.dtype.itemsize
    if N <= 8:
        tn = N                                    # single tiny block (== full dim)
    else:
        # ~target_block_bytes of x per grid step (measured sweet spot ~1-2 MiB),
        # rounded to a sublane multiple.
        tn = max(8, (target_block_bytes // row_bytes) // 8 * 8)
        # Never collapse to one (or too few) steps: keep >= min_grid_steps so the DMA
        # pipeline has depth and v7x's two TensorCores both get row tiles.
        tn = min(tn, _round_up(pl.cdiv(N, min_grid_steps), 8))
        tn = max(tn, 8)
    grid = (pl.cdiv(N, tn),)

    x_isize = x.dtype.itemsize
    cost = pl.CostEstimate(
        flops=2 * N * D_in * D_out,
        transcendentals=N,                        # one rsqrt per merged row
        bytes_accessed=N * D_in * x_isize
        + D_in * D_out * w.dtype.itemsize
        + N * D_out * x_isize,
    )

    out = pl.pallas_call(
        _seg_merging_kernel,
        out_shape=jax.ShapeDtypeStruct((N, D_out), x.dtype),
        grid_spec=pltpu.PrefetchScalarGridSpec(
            num_scalar_prefetch=0,
            grid=grid,
            in_specs=[
                # streamed row tiles (double-buffered by default)
                pl.BlockSpec((tn, D_in), lambda i: (i, 0)),
                # grid-invariant operands: single-buffered (constant index_map)
                pl.BlockSpec((D_in, D_out), lambda i: (0, 0),
                             pipeline_mode=pl.Buffered(1)),
                pl.BlockSpec((1, D_in), lambda i: (0, 0),
                             pipeline_mode=pl.Buffered(1)),
                pl.BlockSpec((1, D_in), lambda i: (0, 0),
                             pipeline_mode=pl.Buffered(1)),
                pl.BlockSpec((1, D_out), lambda i: (0, 0),
                             pipeline_mode=pl.Buffered(1)),
            ],
            out_specs=pl.BlockSpec((tn, D_out), lambda i: (i, 0)),
        ),
        compiler_params=pltpu.CompilerParams(
            # shard row tiles across TensorCores (v7x megacore); harmless elsewhere
            dimension_semantics=("parallel",),
            # lifts v5e's 16 MiB scoped default; well under v7x's 64 MiB physical VMEM
            vmem_limit_bytes=32 * 1024 * 1024,
        ),
        cost_estimate=cost,
    )(x_rows, w, gamma2, beta2, bias2)

    # TODO(synk): when D_out (= seg_dim) < 128 the output stores are lane-sparse
    # (masked vst); the clean fixes are (a) fusing with the consumer so the narrow
    # tensor never round-trips HBM, or (b) packing 128//D_out consecutive rows per
    # output row, which needs an in-kernel (tn, D_out)->(tn/k, k*D_out) relayout we
    # have not validated on hardware.  Left unpacked here; at realistic shapes the
    # kernel is HBM-DMA bound and the store slot has slack.
    return out.reshape(B, F, M, D_out)


def seg_merging_ref(x, w, bias, gamma, beta, win_size):
    """Pure-JAX reference mirroring the PyTorch forward."""
    B, F, S, D = x.shape
    pad_num = S % win_size
    if pad_num != 0:
        pad_num = win_size - pad_num
        x = jnp.concatenate([x, x[:, :, -pad_num:, :]], axis=2)
    segs = [x[:, :, i::win_size, :] for i in range(win_size)]
    xm = jnp.concatenate(segs, axis=-1).astype(jnp.float32)
    mean = jnp.mean(xm, axis=-1, keepdims=True)
    var = jnp.mean((xm - mean) ** 2, axis=-1, keepdims=True)
    xn = (xm - mean) / jnp.sqrt(var + 1e-5) * gamma.astype(jnp.float32) + beta.astype(jnp.float32)
    return xn @ w.astype(jnp.float32) + bias.astype(jnp.float32)


if __name__ == "__main__":
    key = jax.random.PRNGKey(0)
    kx, kw, kb, kx2 = jax.random.split(key, 4)

    # Shapes consistent with the module's forward: B, n_feat, n_seg, seg_dim
    B, F, S, D = 2, 4, 7, 32          # S=7 exercises the replicate-pad branch
    win = 2
    D_in, D_out = win * D, D          # Linear(win*seg_dim -> seg_dim)

    x = jax.random.normal(kx, (B, F, S, D), dtype=jnp.float32)
    w = jax.random.normal(kw, (D_in, D_out), dtype=jnp.float32) * (1.0 / jnp.sqrt(D_in))
    bias = jax.random.normal(kb, (D_out,), dtype=jnp.float32) * 0.01
    gamma = jnp.ones((D_in,), dtype=jnp.float32)   # LayerNorm weight
    beta = jnp.zeros((D_in,), dtype=jnp.float32)   # LayerNorm bias

    # --- Test 1: tiny shape, pad branch, multi-step grid (N=32 -> 4 steps of 8 rows) ---
    out = jax.block_until_ready(seg_merging_pallas(x, w, bias, gamma, beta, win))
    ref = seg_merging_ref(x, w, bias, gamma, beta, win)
    assert out.shape == (B, F, (S + 1) // win, D_out), out.shape
    assert jnp.allclose(out, ref, atol=1e-4, rtol=1e-4), float(jnp.max(jnp.abs(out - ref)))

    # --- Test 2: larger seq -> partial last row tile on the pipelined multi-step grid ---
    S2 = 33                            # pads to 34 -> M=17 -> N=136 rows -> 4 steps of 40
    x2 = jax.random.normal(kx2, (B, F, S2, D), dtype=jnp.float32)
    out2 = jax.block_until_ready(seg_merging_pallas(x2, w, bias, gamma, beta, win))
    ref2 = seg_merging_ref(x2, w, bias, gamma, beta, win)
    assert out2.shape == ref2.shape, (out2.shape, ref2.shape)
    assert jnp.allclose(out2, ref2, atol=1e-4, rtol=1e-4), \
        float(jnp.max(jnp.abs(out2 - ref2)))

    # --- Test 3: bf16 activations/weights -> native-rate MXU path (looser tolerance) ---
    out3 = jax.block_until_ready(
        seg_merging_pallas(x.astype(jnp.bfloat16), w.astype(jnp.bfloat16),
                           bias.astype(jnp.bfloat16), gamma.astype(jnp.bfloat16),
                           beta.astype(jnp.bfloat16), win))
    assert jnp.allclose(out3.astype(jnp.float32), ref, atol=2e-1, rtol=2e-1), \
        float(jnp.max(jnp.abs(out3.astype(jnp.float32) - ref)))

    print("KERNEL_OK")
</pallas_src>

<mosaic_0001>
module attributes {stable_mosaic.version = 11 : i64} {
  func.func @_seg_merging_kernel(%arg0: i32, %arg1: memref<8x64xf32, #tpu.memory_space<vmem>>, %arg2: memref<64x32xf32, #tpu.memory_space<vmem>>, %arg3: memref<1x64xf32, #tpu.memory_space<vmem>>, %arg4: memref<1x64xf32, #tpu.memory_space<vmem>>, %arg5: memref<1x32xf32, #tpu.memory_space<vmem>>, %arg6: memref<8x32xf32, #tpu.memory_space<vmem>>) attributes {dimension_semantics = [#tpu.dimension_semantics<parallel>], iteration_bounds = array<i64: 4>, scalar_prefetch = 0 : i64, scratch_operands = 0 : i64, tpu.core_type = #tpu.core_type<tc>, window_params = [{transform_indices = @transform_0, window_bounds = array<i64: 8, 64>}, {pipeline_mode = #tpu.pipeline_mode<synchronous>, transform_indices = @transform_1, window_bounds = array<i64: 64, 32>}, {pipeline_mode = #tpu.pipeline_mode<synchronous>, transform_indices = @transform_2, window_bounds = array<i64: 1, 64>}, {pipeline_mode = #tpu.pipeline_mode<synchronous>, transform_indices = @transform_3, window_bounds = array<i64: 1, 64>}, {pipeline_mode = #tpu.pipeline_mode<synchronous>, transform_indices = @transform_4, window_bounds = array<i64: 1, 32>}, {transform_indices = @transform_5, window_bounds = array<i64: 8, 32>}]} {
    %c0 = arith.constant 0 : index
    %c0_0 = arith.constant 0 : index
    %0 = vector.load %arg1[%c0, %c0_0] : memref<8x64xf32, #tpu.memory_space<vmem>>, vector<8x64xf32>
    %cst = arith.constant dense<0.000000e+00> : vector<8xf32>
    %1 = vector.multi_reduction <add>, %0, %cst [1] : vector<8x64xf32> to vector<8xf32>
    %2 = vector.shape_cast %1 : vector<8xf32> to vector<8x1xf32>
    %cst_1 = arith.constant 6.400000e+01 : f32
    %3 = vector.broadcast %cst_1 : f32 to vector<8x1xf32>
    %4 = arith.divf %2, %3 : vector<8x1xf32>
    %5 = vector.broadcast %4 : vector<8x1xf32> to vector<8x64xf32>
    %6 = arith.subf %0, %5 : vector<8x64xf32>
    %7 = arith.mulf %6, %6 : vector<8x64xf32>
    %cst_2 = arith.constant dense<0.000000e+00> : vector<8xf32>
    %8 = vector.multi_reduction <add>, %7, %cst_2 [1] : vector<8x64xf32> to vector<8xf32>
    %9 = vector.shape_cast %8 : vector<8xf32> to vector<8x1xf32>
    %cst_3 = arith.constant 6.400000e+01 : f32
    %10 = vector.broadcast %cst_3 : f32 to vector<8x1xf32>
    %11 = arith.divf %9, %10 : vector<8x1xf32>
    %cst_4 = arith.constant 9.99999974E-6 : f32
    %12 = vector.broadcast %cst_4 : f32 to vector<8x1xf32>
    %13 = arith.addf %11, %12 : vector<8x1xf32>
    %14 = math.rsqrt %13 : vector<8x1xf32>
    %15 = vector.broadcast %14 : vector<8x1xf32> to vector<8x64xf32>
    %16 = arith.mulf %6, %15 : vector<8x64xf32>
    %c0_5 = arith.constant 0 : index
    %c0_6 = arith.constant 0 : index
    %17 = vector.load %arg3[%c0_5, %c0_6] : memref<1x64xf32, #tpu.memory_space<vmem>>, vector<1x64xf32>
    %18 = vector.broadcast %17 : vector<1x64xf32> to vector<8x64xf32>
    %19 = arith.mulf %16, %18 : vector<8x64xf32>
    %c0_7 = arith.constant 0 : index
    %c0_8 = arith.constant 0 : index
    %20 = vector.load %arg4[%c0_7, %c0_8] : memref<1x64xf32, #tpu.memory_space<vmem>>, vector<1x64xf32>
    %21 = vector.broadcast %20 : vector<1x64xf32> to vector<8x64xf32>
    %22 = arith.addf %19, %21 : vector<8x64xf32>
    %c0_9 = arith.constant 0 : index
    %c0_10 = arith.constant 0 : index
    %23 = vector.load %arg2[%c0_9, %c0_10] : memref<64x32xf32, #tpu.memory_space<vmem>>, vector<64x32xf32>
    %cst_11 = arith.constant dense<0.000000e+00> : vector<8x32xf32>
    %24 = tpu.matmul %22, %23, %cst_11 {dimension_numbers = #tpu.dot_dimension_numbers<[1], [0], [0], [1], [0, 0, 1, 1], [], []>} : vector<8x64xf32>, vector<64x32xf32>, vector<8x32xf32> -> vector<8x32xf32>
    %c0_12 = arith.constant 0 : index
    %c0_13 = arith.constant 0 : index
    %25 = vector.load %arg5[%c0_12, %c0_13] : memref<1x32xf32, #tpu.memory_space<vmem>>, vector<1x32xf32>
    %26 = vector.broadcast %25 : vector<1x32xf32> to vector<8x32xf32>
    %27 = arith.addf %24, %26 : vector<8x32xf32>
    %c0_14 = arith.constant 0 : index
    %c0_15 = arith.constant 0 : index
    %28 = vector.load %arg6[%c0_14, %c0_15] : memref<8x32xf32, #tpu.memory_space<vmem>>, vector<8x32xf32>
    tpu.vector_store %arg6[%c0_14, %c0_15], %27 {strides = array<i32>} : memref<8x32xf32, #tpu.memory_space<vmem>>, vector<8x32xf32>,
    return
  }
  func.func @transform_0(%arg0: i32) -> (i32, i32) {
    %c0_i32 = arith.constant 0 : i32
    %c0_i32_0 = arith.constant 0 : i32
    return %arg0, %c0_i32 : i32, i32
  }
  func.func @transform_1(%arg0: i32) -> (i32, i32) {
    %c0_i32 = arith.constant 0 : i32
    %c0_i32_0 = arith.constant 0 : i32
    %c0_i32_1 = arith.constant 0 : i32
    return %c0_i32, %c0_i32_0 : i32, i32
  }
  func.func @transform_2(%arg0: i32) -> (i32, i32) {
    %c0_i32 = arith.constant 0 : i32
    %c0_i32_0 = arith.constant 0 : i32
    %c0_i32_1 = arith.constant 0 : i32
    return %c0_i32, %c0_i32_0 : i32, i32
  }
  func.func @transform_3(%arg0: i32) -> (i32, i32) {
    %c0_i32 = arith.constant 0 : i32
    %c0_i32_0 = arith.constant 0 : i32
    %c0_i32_1 = arith.constant 0 : i32
    return %c0_i32, %c0_i32_0 : i32, i32
  }
  func.func @transform_4(%arg0: i32) -> (i32, i32) {
    %c0_i32 = arith.constant 0 : i32
    %c0_i32_0 = arith.constant 0 : i32
    %c0_i32_1 = arith.constant 0 : i32
    return %c0_i32, %c0_i32_0 : i32, i32
  }
  func.func @transform_5(%arg0: i32) -> (i32, i32) {
    %c0_i32 = arith.constant 0 : i32
    %c0_i32_0 = arith.constant 0 : i32
    return %arg0, %c0_i32 : i32, i32
  }
}

</mosaic_0001>

<bundles_post_ra>
// kernel: tpu_custom_call.1
= control target key start
LH: loop header
LB: loop body
LE: loop exit
PB: predicated region body
PF: predicated region fallthrough
CT: control target
= control target key end

     0   :  { %10 = vsyncpa [#allocation3], 0  ;;  %s747_s0 = inlined_call_operand.vmem [shape: f32[32,64], index: 0, kind: input, shape index: {}]   ;;  %s748_s1 = inlined_call_operand.vmem [shape: f32[64,32], index: 1, kind: input, shape index: {}]   ;;  %s749_s2 = inlined_call_operand.vmem [shape: f32[1,64], index: 2, kind: input, shape index: {}]   ;;  %s750_s3 = inlined_call_operand.vmem [shape: f32[1,64], index: 3, kind: input, shape index: {}]   ;;  %s751_s4 = inlined_call_operand.vmem [shape: f32[1,32], index: 4, kind: input, shape index: {}]   ;;  %s752_s5 = inlined_call_operand.hbm [shape: f32[32,32], index: 5, kind: output, shape index: {}]  }
   0x1   :  { %12 = vsyncpa [#allocation3 + $0x1], 0  ;;  %s611_s18 = smov 0   ;;  %s613_s19 = smov 0  }
   0x2   :  { %s615_s20 = smov 0   ;;  %s617_s21 = smov 0  }
   0x3 LB: > { %s632_s22 = sadd.s32 4294967295, %s575_s21   ;;  %s415_s23 = sadd.s32 4294967294, %s575_s21   ;;  %s575_s21 = sphi %s617_s21, %s758_s21   ;;  %s571_s20 = sphi %s615_s20, %s757_s20   ;;  %s567_s19 = sphi %s613_s19, %s756_s19   ;;  %s563_s18 = sphi %s611_s18, %s755_s18  }
   0x4   : > { %s636_s24 = sadd.s32 1, %s575_s21   ;;  %s135_s25 = sadd.s32 1, %s571_s20 }
   0x5   : > { %s132_s26 = ssub.s32 %s575_s21, %s636_s24  ;;  %p145_p0 = scmp.ne.s32.totalorder %s571_s20, %s567_s19 }
   0x6   : > { %p133_p1 = scmp.eq.s32.totalorder %s132_s26, 0  ;;  %p146_p2 = scmp.eq.s32.totalorder %s632_s22, 3 }
   0x7   : > { %p151_p3 = scmp.ne.s32.totalorder %s567_s19, %s563_s18  ;;  %p152_p4 = scmp.eq.s32.totalorder %s415_s23, 3 }
   0x8   : > { %s647_s27 = scalar_select %p133_p1, %s571_s20, %s135_s25  }
   0x9   : > { %p649_p5 = por %p146_p2, %p145_p0  ;;  %p653_p6 = por %p152_p4, %p151_p3 }
   0xa   : > { %p418_p7 = scmp.ge.s32.totalorder %s575_s21, 1  ;;  %p189_p8 = scmp.lt.s32.totalorder %s575_s21, 5 }
   0xc   : > { %p190_p9 = pnand %p418_p7, %p189_p8 }
   0xd   : > { %p216_p10 = scmp.lt.s32.totalorder (!%p190_p9), %s632_s22, 3  ;;  %vm221_vm0 = vcmask (!%p190_p9), 523264   ;;  %v252_v7 = vld [vmem:[%s748_s1] sm:$0xff] (!%p190_p9)  ;;  %v253_v8 = vld [vmem:[%s748_s1 + $0x8] sm:$0xff] (!%p190_p9)  ;;  %v254_v10 = vld [vmem:[%s748_s1 + $0x10] sm:$0xff] (!%p190_p9)  ;;  %v577_v12 = vmov (!%p190_p9), 0.0|0.0  }
   0xe   : > { %193 = sbr.rel (%p190_p9) target bundleno = 567 (0x237), region = 40  ;;  %v458_v9 = vpack.c.bf16 (!%p190_p9), %v253_v8, %v252_v7  ;;  %v255_v11 = vld [vmem:[%s748_s1 + $0x18] sm:$0xff] (!%p190_p9)  ;;  %457 = vmatprep.subr.bf16.mxu0 (!%p190_p9), %v577_v12  ;;  %vm578_vm1 = vmmov (!%p190_p9), 0   ;;  %v579_v13 = vmov (!%p190_p9), 0.0   ;;  %v256_v15 = vld [vmem:[%s748_s1 + $0x20] sm:$0xff] (!%p190_p9)  ;;  %v257_v16 = vld [vmem:[%s748_s1 + $0x28] sm:$0xff] (!%p190_p9) }
   0xf   : > { %454 = vmatprep.mubr.msk.f32.mxu0 (!%p190_p9), %vm578_vm1, %v579_v13  ;;  %v461_v14 = vpack.c.bf16 (!%p190_p9), %v255_v11, %v254_v10  ;;  %v464_v17 = vpack.c.bf16 (!%p190_p9), %v257_v16, %v256_v15  ;;  %v258_v18 = vld [vmem:[%s748_s1 + $0x30] sm:$0xff] (!%p190_p9)  ;;  %v259_v19 = vld [vmem:[%s748_s1 + $0x38] sm:$0xff] (!%p190_p9)  ;;  %v421_v25 = vld [vmem:[%s749_s2] ss:$0 sm:$0xff] (!%p190_p9)  ;;  %s213_s14 = sand.u32 (!%p190_p9), 1, %s567_s19   ;;  %s426_s23 = sshll.u32 (!%p190_p9), %s632_s22, 7 }
  0x10   : > { %459 = vmatpush3.bf16.msra.mxu0 (!%p190_p9), %v458_v9  ;;  %v467_v20 = vpack.c.bf16 (!%p190_p9), %v259_v19, %v258_v18  ;;  %v422_v27 = vld [vmem:[%s750_s3] ss:$0 sm:$0xff] (!%p190_p9)  ;;  %s419_s15 = sshll.u32 (!%p190_p9), %s213_s14, 3  ;;  %vm340_vm2 = vcmask (!%p190_p9), 261120   ;;  %s705_s7 = scalar_lea.hbm (!%p190_p9), %s752_s5, %s426_s23 }
  0x11   : > { %460 = vmatprep.subr.bf16.mxu0 (!%p190_p9), %v577_v12  ;;  %v423_v30 = vld [vmem:[%s751_s4] ss:$0 sm:$0xff] (!%p190_p9)  ;;  %s215_s25 = scalar_lea.vmem (!%p190_p9), [#allocation2], %s419_s15  ;;  %s343_s8 = scalar_lea.sflag (!%p190_p9), [#allocation3], %s213_s14 }
  0x12   : > { %s356_s26 = sshll.u32 (!%p190_p9), %s215_s25, 4  ;;  %s707_s26 = int_to_ptr.vmem [resolvable:$true] %s356_s26 }
  0x14   : > { %462 = vmatpush3.bf16.msra.mxu0 (!%p190_p9), %v461_v14 }
  0x15   : > { %s217_s30 = scalar_select %p216_p10, %s632_s22, 3  ;;  %463 = vmatprep.subr.bf16.mxu0 %v577_v12 }
  0x16   : > { %s580_s22 = smov [#allocation2]  }
  0x17   : > { %s420_s6 = sshll.u32 %s217_s30, 3  ;;  %s517_s10 = sshll.u32 %s580_s22, 4  ;;  %s518_s10 = int_to_ptr.vmem [resolvable:$false] %s517_s10 }
  0x18   : > { %s219_s9 = scalar_lea.vmem %s747_s0, %s420_s6  ;;  %465 = vmatpush3.bf16.msra.mxu0 %v464_v17  ;;  %s519_s11 = scalar_lea.vmem %s518_s10, 256 }
  0x19   : > { %v220_v0 = vld [vmem:[%s219_s9] sm:$0xff]  ;;  %466 = vmatprep.subr.bf16.mxu0 %v577_v12  ;;  %s513_s9 = scalar_lea.vmem %s707_s26, 128  ;;  %p520_p0 = scmp.lt.s32.totalorder %s707_s26, %s518_s10 }
  0x1a   : > { %v222_v1 = vsel %vm221_vm0, %v220_v0, 0.0  ;;  %p514_p11 = scmp.ne.s32.totalorder %s707_s26, %s513_s9  ;;  %p521_p1 = scmp.lt.s32.totalorder %s519_s11, %s513_s9 }
  0x1b   : > { %223 = vadd.xlane.f32.xlu0 %v222_v1 }
  0x1c   : > { %468 = vmatpush3.bf16.msra.mxu0 %v467_v20  ;;  %p515_p12 = pnand %p514_p11, %p649_p5  ;;  %p522_p2 = por %p521_p1, %p520_p0 }
  0x1e   : > { %p516_p13 = pneg %p515_p12 }
  0x20   : > { %p523_p3 = pnand %p522_p2, %p516_p13 }
  0xa8   : > { %v224_v2 = vpop.xlane.xlu0 %223 }
  0xa9   : > { %v226_v3 = vmul.f32 0.015625, %v224_v2 }
  0xab   : > { %v227_v4 = vsub.f32 %v220_v0, %v226_v3 }
  0xad   : > { %v228_v5 = vmul.f32 %v227_v4, %v227_v4 }
  0xaf   : > { %v229_v6 = vsel %vm221_vm0, %v228_v5, 0.0 }
  0xb0   : > { %230 = vadd.xlane.f32.xlu0 %v229_v6 }
 0x13d   : > { %v231_v21 = vpop.xlane.xlu0 %230 }
 0x13e   : > { %v232_v22 = vmul.f32 0.015625, %v231_v21 }
 0x140   : > { %v233_v23 = vadd.f32 1e-05, %v232_v22 }
 0x142   : > { %511 = vrsqrt.f32 %v233_v23 }
 0x14c   : > { %v512_v24 = vpop.eup %511 }
 0x14d   : > { %v235_v26 = vmul.f32 %v512_v24, %v227_v4 }
 0x14f   : > { %v243_v28 = vmul.f32 %v421_v25, %v235_v26 }
 0x151   : > { %v251_v29 = vadd.f32 %v422_v27, %v243_v28 }
 0x153   : > { %455 = vmatmul.mubr.msk.f32.vlgmr.msra.gmra.mrb[0].mxu0 %vm221_vm0, %v251_v29 }
 0x226   : > { %v336_v31 = vpop.f32.mrb[0].mxu0 }
 0x227   : > { %v337_v32 = vadd.f32 %v423_v30, %v336_v31  ;;  %v456_v33 = vpop.f32.mrb[1].mxu0 }
 0x229   : > { %341 = vst.msk [vmem:[%s215_s25] sm:$0xff] %vm340_vm2, %v337_v32 }
 0x22a   : > { %526 = shalt.err (!%p523_p3)
}
 0x22b   : > { %s527_s12 = scalar_lea.hbm %s705_s7, 128  ;;  %s531_s15 = scalar_lea.hbm %s752_s5, 512 }
 0x22c   : > { %p528_p4 = scmp.ne.s32.totalorder %s705_s7, %s527_s12  ;;  %p532_p9 = scmp.lt.u32.totalorder %s705_s7, %s752_s5 }
 0x22d   : > { %p533_p10 = scmp.lt.u32.totalorder %s531_s15, %s527_s12  ;;  %p535_p12 = scmp.lt.u32.totalorder %s527_s12, %s705_s7 }
 0x22e   : > { %p529_p7 = pnand %p528_p4, %p649_p5 }
 0x22f   : > { %p534_p11 = por %p533_p10, %p532_p9 }
 0x230   : > { %p530_p8 = pneg %p529_p7 }
 0x231   : > { %p536_p13 = por %p535_p12, %p534_p11 }
 0x233   : > { %p537_p0 = pnand %p536_p13, %p530_p8 }
 0x235   : > { %540 = shalt.err (!%p537_p0)
}
 0x236   : > { %469 = dma.vmem_to_hbm [thread:$0]  (%p649_p5), %s707_s26, 128, %s705_s7, %s343_s8  }
 0x237 PF: > { %p475_p1 = scmp.ge.s32.totalorder %s575_s21, 2  ;;  %s368_s23 = sand.u32 1, %s563_s18  }
 0x238   : > { %s369_s25 = scalar_lea.sflag [#allocation3], %s368_s23 }
 0x239   : > { %p472_p2 = pnand %p475_p1, %p653_p6 }
 0x23b   : > { %558 = dma.done.wait (!%p472_p2), %s369_s25, 128  }
 0x23c   : > { %560 = vsyncadd (!%p472_p2), %s369_s25, 4294967168  ;;  %p15_p3 = scmp.ge.s32.totalorder %s636_s24, 6   ;;  %s755_s18 = smov %s567_s19 }
 0x23d   : > { %s756_s19 = smov %s571_s20  ;;  %s757_s20 = smov %s647_s27 }
 0x23e   : > { %s758_s21 = smov %s636_s24  ;;  %17 = sbr.rel (!%p15_p3) target bundleno = 3 (0x3), region = 75 }
 0x245   :  { %374 = vsyncpa [#allocation3], 1 }
 0x246   :  { %376 = vsyncpa [#allocation3 + $0x1], 1 }

</bundles_post_ra>
